<compile_context>
chip_gen: v5e
topology: v5e:2x2
jax: 0.10.0
libtpu: 0.0.40
codegen_flags: <defaults>
</compile_context>

<pallas_src>
import functools
import math

import jax
import jax.numpy as jnp
import numpy as np
from jax.experimental import pallas as pl
from jax.experimental.pallas import tpu as pltpu


# ----------------------------------------------------------------------------
# Pallas kernel
# ----------------------------------------------------------------------------
def mh_attention_kernel(x_ref, wall_ref, wzbd_ref, z1_ref, z2_ref, prob_ref,
                        *, multi_head, outplanes, hw_real, bcast_via_load):
    """Processes `bblk` batch elements per grid step, channel-major.

    x_ref    : (bblk, Cin, HWP)        input, HWP = HW padded to 128*k
    wall_ref : (6*MH*Cout, Cin)        all Q1/K1/V1/Q2/K2/V2 weights, all heads
    wzbd_ref : (2*Cin, 2*MH*Cout)      block_diag(makeZ1, makeZ1)
    z*_ref   : (bblk, Cin, HWP)        outputs (padded lanes are zeros)
    prob_ref : VMEM scratch holding softmax rows for stride-0 broadcasts
    """
    bblk, cin, hwp = x_ref.shape
    cout = outplanes
    mh = multi_head
    nq = 2 * mh                               # query rows per batch element
    inv_sqrt = jnp.float32(1.0 / math.sqrt(outplanes))
    neg_big = jnp.float32(-1e30)

    # Lane-validity mask for the joint (2*HWP)-wide score rows: lanes
    # [hw_real, hwp) and [hwp + hw_real, 2*hwp) are padding and must not
    # contribute to the softmax.  Hoisted out of the batch loop.
    col = jax.lax.broadcasted_iota(jnp.int32, (nq, 2 * hwp), 1)
    valid = (col < hw_real) | ((col >= hwp) & (col < hwp + hw_real))

    wall = wall_ref[...]                      # (6*MH*Cout, Cin)
    wzbd = wzbd_ref[...]                      # (2*Cin, 2*MH*Cout)

    for b in range(bblk):                     # static unroll (bblk is 1 or B)
        x = x_ref[b]                          # (Cin, HWP)

        # One fused MXU matmul for every per-head Q1/K1/V1/Q2/K2/V2.
        proj = jnp.dot(wall, x, preferred_element_type=jnp.float32)

        rows = []                             # 2*MH joint score rows
        vs = []                               # per-head (V1, V2)
        for h in range(mh):
            base = h * 6 * cout               # multiples of 8 -> aligned slices
            q1 = proj[base + 0 * cout: base + 1 * cout]
            k1 = proj[base + 1 * cout: base + 2 * cout]
            v1 = proj[base + 2 * cout: base + 3 * cout]
            q2 = proj[base + 3 * cout: base + 4 * cout]
            k2 = proj[base + 4 * cout: base + 5 * cout]
            v2 = proj[base + 5 * cout: base + 6 * cout]
            vs.append((v1, v2))

            s11 = jnp.sum(q1 * k1, axis=0, keepdims=True)   # (1, HWP)
            s12 = jnp.sum(q1 * k2, axis=0, keepdims=True)
            s21 = jnp.sum(q2 * k1, axis=0, keepdims=True)
            s22 = jnp.sum(q2 * k2, axis=0, keepdims=True)
            # Joint row per query: both score maps side by side on lanes
            # (HWP is a multiple of 128 so the concat is vreg-aligned).
            rows.append(jnp.concatenate([s11, s12], axis=1))  # query 1 of head
            rows.append(jnp.concatenate([s21, s22], axis=1))  # query 2 of head

        scores = jnp.concatenate(rows, axis=0) * inv_sqrt      # (2*MH, 2*HWP)
        scores = jnp.where(valid, scores, neg_big)

        # Batched joint softmax: ONE lane reduce for the max and ONE for the
        # sum, covering all 2*MH query rows at once.
        row_max = jnp.max(scores, axis=1, keepdims=True)       # (2*MH, 1)
        e = jnp.exp(scores - row_max)                          # (2*MH, 2*HWP)
        denom = jnp.sum(e, axis=1, keepdims=True)              # (2*MH, 1)
        # Exact divide once per row (approx reciprocal would miss 1e-5 tol).
        probs = e * (1.0 / denom)

        if bcast_via_load:
            # Stage probabilities in VMEM so the (1,HWP)->(Cout,HWP)
            # broadcasts below come through stride-0 loads (vld slot) instead
            # of XLU sublane broadcasts.
            prob_ref[pl.ds(b * nq, nq), :] = probs

        z1_parts, z2_parts = [], []
        for h in range(mh):
            v1, v2 = vs[h]
            for qi, parts in ((0, z1_parts), (1, z2_parts)):
                r = 2 * h + qi
                if bcast_via_load:
                    row = b * nq + r
                    pa = prob_ref[pl.ds(row, cout, stride=0), pl.ds(0, hwp)]
                    pb = prob_ref[pl.ds(row, cout, stride=0), pl.ds(hwp, hwp)]
                else:
                    pa = probs[r:r + 1, 0:hwp]        # (1,HWP), implicit bcast
                    pb = probs[r:r + 1, hwp:2 * hwp]
                parts.append(pa * v1 + pb * v2)       # (Cout, HWP)

        # Fused output projection: block_diag(makeZ1, makeZ1) applied to the
        # sublane-stacked [Z1 heads; Z2 heads] -> one MXU matmul.
        zall = jnp.concatenate(z1_parts + z2_parts, axis=0)  # (2*MH*Cout, HWP)
        out = jnp.dot(wzbd, zall, preferred_element_type=jnp.float32)
        z1_ref[b] = out[0:cin, :]
        z2_ref[b] = out[cin:2 * cin, :]


# ----------------------------------------------------------------------------
# Wrapper
# ----------------------------------------------------------------------------
def _single_tensorcore_device():
    """True for chips with a single TensorCore per device (v5e / v6e)."""
    try:
        kind = jax.devices()[0].device_kind.lower()
    except Exception:
        return False
    single = ("v5e", "v5 lite", "v5lite", "v6e", "v6 lite", "v6lite", "trillium")
    return any(tag in kind for tag in single)


def _run_pallas(x_pad, w_all, wz_bd, *, multi_head, outplanes, hw_real,
                bcast_via_load):
    B, cin, hwp = x_pad.shape
    nq = 2 * multi_head

    if B > 1 and not _single_tensorcore_device():
        # 2 TensorCores (v7x / megacore v4-v5p): shard the batch across cores.
        bblk, grid, semantics = 1, (B,), ("parallel",)
    else:
        # Single TensorCore (v5e/v6e): one grid step, batch looped in-kernel
        # (saves per-step grid overhead and improves VLIW slot fill).
        bblk, grid, semantics = B, (1,), ("arbitrary",)
        # TODO(synk): if B were 1 on a 2-TC chip, a second parallel grid axis
        # over head/query groups would be needed to keep both cores busy.

    kernel = functools.partial(
        mh_attention_kernel, multi_head=multi_head, outplanes=outplanes,
        hw_real=hw_real, bcast_via_load=bcast_via_load)

    x_spec = pl.BlockSpec((bblk, cin, hwp), lambda b: (b, 0, 0))
    out_spec = pl.BlockSpec((bblk, cin, hwp), lambda b: (b, 0, 0))
    # Constant index maps keep the (tiny) weights resident in VMEM across
    # grid steps (no re-DMA per batch element).
    wall_spec = pl.BlockSpec(w_all.shape, lambda b: (0, 0))
    wzbd_spec = pl.BlockSpec(wz_bd.shape, lambda b: (0, 0))

    # Softmax-row scratch.  The extra (Cout-1) rows are headroom so that a
    # conservative start+size bounds check of the stride-0 broadcast window
    # can never trip for the last row.
    prob_scratch = pltpu.VMEM((bblk * nq + outplanes - 1, 2 * hwp), jnp.float32)

    nproj = 6 * multi_head * outplanes
    flops_per_b = (
        2 * nproj * cin * hwp                                    # fused QKV matmul
        + 8 * multi_head * outplanes * hwp                       # score maps
        + 20 * multi_head * hwp                                  # softmax elementwise
        + 12 * multi_head * outplanes * hwp                      # prob * V
        + 2 * (2 * cin) * (2 * multi_head * outplanes) * hwp)    # output matmul
    cost = pl.CostEstimate(
        flops=int(B * flops_per_b),
        transcendentals=int(B * nq * 2 * hwp),
        bytes_accessed=int(4 * (x_pad.size + w_all.size + wz_bd.size
                                + 2 * B * cin * hwp)))

    return pl.pallas_call(
        kernel,
        out_shape=(jax.ShapeDtypeStruct((B, cin, hwp), jnp.float32),
                   jax.ShapeDtypeStruct((B, cin, hwp), jnp.float32)),
        grid_spec=pltpu.PrefetchScalarGridSpec(
            num_scalar_prefetch=0,
            grid=grid,
            in_specs=[x_spec, wall_spec, wzbd_spec],
            out_specs=[out_spec, out_spec],
            scratch_shapes=[prob_scratch]),
        compiler_params=pltpu.CompilerParams(dimension_semantics=semantics),
        cost_estimate=cost,
    )(x_pad, w_all, wz_bd)


def mh_attention_pallas(x1_nchw, x2_nchw, w_all, wz, *, multi_head, outplanes):
    """x1/x2: (B, Cin, 14, 14).  Returns (Z1, Z2), each (B, Cin, 14, 14)."""
    del x2_nchw  # the module's forward never reads x2
    B, cin, H, W = x1_nchw.shape
    hw = H * W
    hwp = ((hw + 127) // 128) * 128          # pad spatial axis to a 128 multiple
    x_cm = x1_nchw.reshape(B, cin, hw)       # channel-major, no host transpose
    x_pad = jnp.pad(x_cm, ((0, 0), (0, 0), (0, hwp - hw)))

    # Fuse both output projections (PyTorch applies makeZ1 to Z1 AND Z2;
    # makeZ2 is unused) into one matmul with a block-diagonal weight.
    mhco = multi_head * outplanes
    wz_bd = jnp.zeros((2 * cin, 2 * mhco), dtype=x_pad.dtype)
    wz_bd = wz_bd.at[:cin, :mhco].set(wz).at[cin:, mhco:].set(wz)

    kwargs = dict(multi_head=multi_head, outplanes=outplanes, hw_real=hw)
    try:
        z1p, z2p = _run_pallas(x_pad, w_all, wz_bd, bcast_via_load=True,
                               **kwargs)
    except Exception:
        # Conservative fallback: identical math, probability broadcasts done
        # arithmetically instead of via stride-0 VMEM loads.
        z1p, z2p = _run_pallas(x_pad, w_all, wz_bd, bcast_via_load=False,
                               **kwargs)

    z1 = z1p[:, :, :hw].reshape(B, cin, H, W)
    z2 = z2p[:, :, :hw].reshape(B, cin, H, W)
    return z1, z2


# ---------------- pure-JAX reference (mirrors the PyTorch code) -------------
_PREC = jax.lax.Precision.HIGHEST   # keep the f32 reference exact on TPU


def _conv1x1(x, w):  # x: (B,C,H,W), w: (O,C)
    return jnp.einsum('bchw,oc->bohw', x, w, precision=_PREC)


def _sh_forward_ref(x1, wq1, wk1, wv1, wq2, wk2, wv2, outplanes):
    B, _, H, W = x1.shape
    HW = H * W
    Q1, K1, V1 = _conv1x1(x1, wq1), _conv1x1(x1, wk1), _conv1x1(x1, wv1)
    Q2, K2, V2 = _conv1x1(x1, wq2), _conv1x1(x1, wk2), _conv1x1(x1, wv2)
    scale = 1.0 / math.sqrt(outplanes)

    def z_from(Q):
        s_a = (Q * K1).sum(axis=1) * scale
        s_b = (Q * K2).sum(axis=1) * scale
        cat = jnp.concatenate([s_a.reshape(B, -1), s_b.reshape(B, -1)], axis=1)
        sm = jax.nn.softmax(cat, axis=1)
        p_a = sm[:, :HW].reshape(B, 1, H, W)
        p_b = sm[:, HW:].reshape(B, 1, H, W)
        return p_a * V1 + p_b * V2

    return z_from(Q1), z_from(Q2)


def mh_attention_ref(x1, head_weights, wz_torch, outplanes):
    z1s, z2s = [], []
    for (wq1, wk1, wv1, wq2, wk2, wv2) in head_weights:
        z1, z2 = _sh_forward_ref(x1, wq1, wk1, wv1, wq2, wk2, wv2, outplanes)
        z1s.append(z1)
        z2s.append(z2)
    Z1 = jnp.concatenate(z1s, axis=1)
    Z2 = jnp.concatenate(z2s, axis=1)
    # both go through makeZ1, exactly as in the PyTorch module (makeZ2 unused)
    return _conv1x1(Z1, wz_torch), _conv1x1(Z2, wz_torch)


if __name__ == "__main__":
    B, inplanes, outplanes, multi_head = 2, 8, 8, 2
    H = W = 14  # fixed by the module (score[:, :196].reshape(..., 14, 14))

    key = jax.random.PRNGKey(0)
    keys = jax.random.split(key, 2 + 6 * multi_head + 1)
    x1 = jax.random.normal(keys[0], (B, inplanes, H, W), dtype=jnp.float32)
    x2 = jax.random.normal(keys[1], (B, inplanes, H, W),
                           dtype=jnp.float32)   # unused by the forward

    # deterministic parameters (PyTorch conv1x1 weights, bias=False)
    head_weights = []
    kidx = 2
    for _ in range(multi_head):
        ws = []
        for _ in range(6):
            ws.append(0.1 * jax.random.normal(keys[kidx],
                                              (outplanes, inplanes),
                                              dtype=jnp.float32))
            kidx += 1
        head_weights.append(tuple(ws))  # order: q1, k1, v1, q2, k2, v2
    wz_torch = 0.1 * jax.random.normal(
        keys[kidx], (inplanes, outplanes * multi_head), dtype=jnp.float32)

    # Pack all projection weights (per head: q1,k1,v1,q2,k2,v2) into one
    # (6*MH*Cout, Cin) matrix for the fused projection matmul.
    w_all = jnp.concatenate(
        [jnp.concatenate(head_weights[h], axis=0) for h in range(multi_head)],
        axis=0)

    z1, z2 = mh_attention_pallas(x1, x2, w_all, wz_torch,
                                 multi_head=multi_head, outplanes=outplanes)
    jax.block_until_ready((z1, z2))

    z1_ref, z2_ref = mh_attention_ref(x1, head_weights, wz_torch, outplanes)
    np.testing.assert_allclose(np.asarray(z1), np.asarray(z1_ref),
                               rtol=1e-5, atol=1e-5)
    np.testing.assert_allclose(np.asarray(z2), np.asarray(z2_ref),
                               rtol=1e-5, atol=1e-5)

    print("KERNEL_OK")
</pallas_src>

<mosaic_0001>
module attributes {stable_mosaic.version = 11 : i64} {
  func.func @mh_attention_kernel(%arg0: i32, %arg1: memref<1x8x256xf32, #tpu.memory_space<vmem>>, %arg2: memref<96x8xf32, #tpu.memory_space<vmem>>, %arg3: memref<16x32xf32, #tpu.memory_space<vmem>>, %arg4: memref<1x8x256xf32, #tpu.memory_space<vmem>>, %arg5: memref<1x8x256xf32, #tpu.memory_space<vmem>>, %arg6: memref<11x512xf32, #tpu.memory_space<vmem>>) attributes {dimension_semantics = [#tpu.dimension_semantics<parallel>], iteration_bounds = array<i64: 2>, scalar_prefetch = 0 : i64, scratch_operands = 1 : i64, tpu.core_type = #tpu.core_type<tc>, window_params = [{transform_indices = @transform_0, window_bounds = array<i64: 1, 8, 256>}, {pipeline_mode = #tpu.pipeline_mode<synchronous>, transform_indices = @transform_1, window_bounds = array<i64: 96, 8>}, {pipeline_mode = #tpu.pipeline_mode<synchronous>, transform_indices = @transform_2, window_bounds = array<i64: 16, 32>}, {transform_indices = @transform_3, window_bounds = array<i64: 1, 8, 256>}, {transform_indices = @transform_4, window_bounds = array<i64: 1, 8, 256>}]} {
    %0 = tpu.iota {dimensions = array<i32: 1>} : vector<4x512xi32>
    %c196_i32 = arith.constant 196 : i32
    %1 = vector.broadcast %c196_i32 : i32 to vector<4x512xi32>
    %2 = arith.cmpi slt, %0, %1 : vector<4x512xi32>
    %c256_i32 = arith.constant 256 : i32
    %3 = vector.broadcast %c256_i32 : i32 to vector<4x512xi32>
    %4 = arith.cmpi sge, %0, %3 : vector<4x512xi32>
    %c452_i32 = arith.constant 452 : i32
    %5 = vector.broadcast %c452_i32 : i32 to vector<4x512xi32>
    %6 = arith.cmpi slt, %0, %5 : vector<4x512xi32>
    %7 = arith.andi %4, %6 : vector<4x512xi1>
    %8 = arith.ori %2, %7 : vector<4x512xi1>
    %c0 = arith.constant 0 : index
    %c0_0 = arith.constant 0 : index
    %9 = vector.load %arg2[%c0, %c0_0] : memref<96x8xf32, #tpu.memory_space<vmem>>, vector<96x8xf32>
    %c0_1 = arith.constant 0 : index
    %c0_2 = arith.constant 0 : index
    %10 = vector.load %arg3[%c0_1, %c0_2] : memref<16x32xf32, #tpu.memory_space<vmem>>, vector<16x32xf32>
    %c0_3 = arith.constant 0 : index
    %c0_4 = arith.constant 0 : index
    %c0_5 = arith.constant 0 : index
    %11 = vector.load %arg1[%c0_3, %c0_4, %c0_5] : memref<1x8x256xf32, #tpu.memory_space<vmem>>, vector<1x8x256xf32>
    %12 = vector.shape_cast %11 : vector<1x8x256xf32> to vector<8x256xf32>
    %cst = arith.constant dense<0.000000e+00> : vector<96x256xf32>
    %13 = tpu.matmul %9, %12, %cst {dimension_numbers = #tpu.dot_dimension_numbers<[1], [0], [0], [1], [0, 0, 1, 1], [], []>} : vector<96x8xf32>, vector<8x256xf32>, vector<96x256xf32> -> vector<96x256xf32>
    %14 = vector.extract_strided_slice %13 {offsets = [0, 0], sizes = [8, 256], strides = [1, 1]} : vector<96x256xf32> to vector<8x256xf32>
    %15 = vector.extract_strided_slice %13 {offsets = [8, 0], sizes = [8, 256], strides = [1, 1]} : vector<96x256xf32> to vector<8x256xf32>
    %16 = vector.extract_strided_slice %13 {offsets = [16, 0], sizes = [8, 256], strides = [1, 1]} : vector<96x256xf32> to vector<8x256xf32>
    %17 = vector.extract_strided_slice %13 {offsets = [24, 0], sizes = [8, 256], strides = [1, 1]} : vector<96x256xf32> to vector<8x256xf32>
    %18 = vector.extract_strided_slice %13 {offsets = [32, 0], sizes = [8, 256], strides = [1, 1]} : vector<96x256xf32> to vector<8x256xf32>
    %19 = vector.extract_strided_slice %13 {offsets = [40, 0], sizes = [8, 256], strides = [1, 1]} : vector<96x256xf32> to vector<8x256xf32>
    %20 = arith.mulf %14, %15 : vector<8x256xf32>
    %cst_6 = arith.constant dense<0.000000e+00> : vector<256xf32>
    %21 = vector.multi_reduction <add>, %20, %cst_6 [0] : vector<8x256xf32> to vector<256xf32>
    %22 = vector.shape_cast %21 : vector<256xf32> to vector<1x256xf32>
    %23 = arith.mulf %14, %18 : vector<8x256xf32>
    %cst_7 = arith.constant dense<0.000000e+00> : vector<256xf32>
    %24 = vector.multi_reduction <add>, %23, %cst_7 [0] : vector<8x256xf32> to vector<256xf32>
    %25 = vector.shape_cast %24 : vector<256xf32> to vector<1x256xf32>
    %26 = arith.mulf %17, %15 : vector<8x256xf32>
    %cst_8 = arith.constant dense<0.000000e+00> : vector<256xf32>
    %27 = vector.multi_reduction <add>, %26, %cst_8 [0] : vector<8x256xf32> to vector<256xf32>
    %28 = vector.shape_cast %27 : vector<256xf32> to vector<1x256xf32>
    %29 = arith.mulf %17, %18 : vector<8x256xf32>
    %cst_9 = arith.constant dense<0.000000e+00> : vector<256xf32>
    %30 = vector.multi_reduction <add>, %29, %cst_9 [0] : vector<8x256xf32> to vector<256xf32>
    %31 = vector.shape_cast %30 : vector<256xf32> to vector<1x256xf32>
    %32 = tpu.concatenate %22, %25 in 1 : vector<1x256xf32>, vector<1x256xf32> -> vector<1x512xf32>
    %33 = tpu.concatenate %28, %31 in 1 : vector<1x256xf32>, vector<1x256xf32> -> vector<1x512xf32>
    %34 = vector.extract_strided_slice %13 {offsets = [48, 0], sizes = [8, 256], strides = [1, 1]} : vector<96x256xf32> to vector<8x256xf32>
    %35 = vector.extract_strided_slice %13 {offsets = [56, 0], sizes = [8, 256], strides = [1, 1]} : vector<96x256xf32> to vector<8x256xf32>
    %36 = vector.extract_strided_slice %13 {offsets = [64, 0], sizes = [8, 256], strides = [1, 1]} : vector<96x256xf32> to vector<8x256xf32>
    %37 = vector.extract_strided_slice %13 {offsets = [72, 0], sizes = [8, 256], strides = [1, 1]} : vector<96x256xf32> to vector<8x256xf32>
    %38 = vector.extract_strided_slice %13 {offsets = [80, 0], sizes = [8, 256], strides = [1, 1]} : vector<96x256xf32> to vector<8x256xf32>
    %39 = vector.extract_strided_slice %13 {offsets = [88, 0], sizes = [8, 256], strides = [1, 1]} : vector<96x256xf32> to vector<8x256xf32>
    %40 = arith.mulf %34, %35 : vector<8x256xf32>
    %cst_10 = arith.constant dense<0.000000e+00> : vector<256xf32>
    %41 = vector.multi_reduction <add>, %40, %cst_10 [0] : vector<8x256xf32> to vector<256xf32>
    %42 = vector.shape_cast %41 : vector<256xf32> to vector<1x256xf32>
    %43 = arith.mulf %34, %38 : vector<8x256xf32>
    %cst_11 = arith.constant dense<0.000000e+00> : vector<256xf32>
    %44 = vector.multi_reduction <add>, %43, %cst_11 [0] : vector<8x256xf32> to vector<256xf32>
    %45 = vector.shape_cast %44 : vector<256xf32> to vector<1x256xf32>
    %46 = arith.mulf %37, %35 : vector<8x256xf32>
    %cst_12 = arith.constant dense<0.000000e+00> : vector<256xf32>
    %47 = vector.multi_reduction <add>, %46, %cst_12 [0] : vector<8x256xf32> to vector<256xf32>
    %48 = vector.shape_cast %47 : vector<256xf32> to vector<1x256xf32>
    %49 = arith.mulf %37, %38 : vector<8x256xf32>
    %cst_13 = arith.constant dense<0.000000e+00> : vector<256xf32>
    %50 = vector.multi_reduction <add>, %49, %cst_13 [0] : vector<8x256xf32> to vector<256xf32>
    %51 = vector.shape_cast %50 : vector<256xf32> to vector<1x256xf32>
    %52 = tpu.concatenate %42, %45 in 1 : vector<1x256xf32>, vector<1x256xf32> -> vector<1x512xf32>
    %53 = tpu.concatenate %48, %51 in 1 : vector<1x256xf32>, vector<1x256xf32> -> vector<1x512xf32>
    %54 = tpu.concatenate %32, %33, %52, %53 in 0 : vector<1x512xf32>, vector<1x512xf32>, vector<1x512xf32>, vector<1x512xf32> -> vector<4x512xf32>
    %cst_14 = arith.constant 0.353553385 : f32
    %55 = vector.broadcast %cst_14 : f32 to vector<4x512xf32>
    %56 = arith.mulf %54, %55 : vector<4x512xf32>
    %cst_15 = arith.constant -1.000000e+30 : f32
    %57 = vector.broadcast %cst_15 : f32 to vector<4x512xf32>
    %58 = arith.select %8, %56, %57 : vector<4x512xi1>, vector<4x512xf32>
    %cst_16 = arith.constant dense<0xFF800000> : vector<4xf32>
    %59 = vector.multi_reduction <maximumf>, %58, %cst_16 [1] : vector<4x512xf32> to vector<4xf32>
    %60 = vector.shape_cast %59 : vector<4xf32> to vector<4x1xf32>
    %61 = vector.broadcast %60 : vector<4x1xf32> to vector<4x512xf32>
    %62 = arith.subf %58, %61 : vector<4x512xf32>
    %63 = math.exp %62 : vector<4x512xf32>
    %cst_17 = arith.constant dense<0.000000e+00> : vector<4xf32>
    %64 = vector.multi_reduction <add>, %63, %cst_17 [1] : vector<4x512xf32> to vector<4xf32>
    %65 = vector.shape_cast %64 : vector<4xf32> to vector<4x1xf32>
    %cst_18 = arith.constant 1.000000e+00 : f32
    %66 = vector.broadcast %cst_18 : f32 to vector<4x1xf32>
    %67 = arith.divf %66, %65 : vector<4x1xf32>
    %68 = vector.broadcast %67 : vector<4x1xf32> to vector<4x512xf32>
    %69 = arith.mulf %63, %68 : vector<4x512xf32>
    %c0_19 = arith.constant 0 : index
    %c0_20 = arith.constant 0 : index
    %70 = vector.load %arg6[%c0_19, %c0_20] : memref<11x512xf32, #tpu.memory_space<vmem>>, vector<4x512xf32>
    tpu.vector_store %arg6[%c0_19, %c0_20], %69 {strides = array<i32>} : memref<11x512xf32, #tpu.memory_space<vmem>>, vector<4x512xf32>,
    %c0_21 = arith.constant 0 : index
    %c0_22 = arith.constant 0 : index
    %71 = tpu.strided_load %arg6[%c0_21, %c0_22] {strides = array<i32: 0, 1>} : memref<11x512xf32, #tpu.memory_space<vmem>>, vector<8x256xf32>
    %c0_23 = arith.constant 0 : index
    %c256 = arith.constant 256 : index
    %72 = tpu.strided_load %arg6[%c0_23, %c256] {strides = array<i32: 0, 1>} : memref<11x512xf32, #tpu.memory_space<vmem>>, vector<8x256xf32>
    %73 = arith.mulf %71, %16 : vector<8x256xf32>
    %74 = arith.mulf %72, %19 : vector<8x256xf32>
    %75 = arith.addf %73, %74 : vector<8x256xf32>
    %c1 = arith.constant 1 : index
    %c0_24 = arith.constant 0 : index
    %76 = tpu.strided_load %arg6[%c1, %c0_24] {strides = array<i32: 0, 1>} : memref<11x512xf32, #tpu.memory_space<vmem>>, vector<8x256xf32>
    %c1_25 = arith.constant 1 : index
    %c256_26 = arith.constant 256 : index
    %77 = tpu.strided_load %arg6[%c1_25, %c256_26] {strides = array<i32: 0, 1>} : memref<11x512xf32, #tpu.memory_space<vmem>>, vector<8x256xf32>
    %78 = arith.mulf %76, %16 : vector<8x256xf32>
    %79 = arith.mulf %77, %19 : vector<8x256xf32>
    %80 = arith.addf %78, %79 : vector<8x256xf32>
    %c2 = arith.constant 2 : index
    %c0_27 = arith.constant 0 : index
    %81 = tpu.strided_load %arg6[%c2, %c0_27] {strides = array<i32: 0, 1>} : memref<11x512xf32, #tpu.memory_space<vmem>>, vector<8x256xf32>
    %c2_28 = arith.constant 2 : index
    %c256_29 = arith.constant 256 : index
    %82 = tpu.strided_load %arg6[%c2_28, %c256_29] {strides = array<i32: 0, 1>} : memref<11x512xf32, #tpu.memory_space<vmem>>, vector<8x256xf32>
    %83 = arith.mulf %81, %36 : vector<8x256xf32>
    %84 = arith.mulf %82, %39 : vector<8x256xf32>
    %85 = arith.addf %83, %84 : vector<8x256xf32>
    %c3 = arith.constant 3 : index
    %c0_30 = arith.constant 0 : index
    %86 = tpu.strided_load %arg6[%c3, %c0_30] {strides = array<i32: 0, 1>} : memref<11x512xf32, #tpu.memory_space<vmem>>, vector<8x256xf32>
    %c3_31 = arith.constant 3 : index
    %c256_32 = arith.constant 256 : index
    %87 = tpu.strided_load %arg6[%c3_31, %c256_32] {strides = array<i32: 0, 1>} : memref<11x512xf32, #tpu.memory_space<vmem>>, vector<8x256xf32>
    %88 = arith.mulf %86, %36 : vector<8x256xf32>
    %89 = arith.mulf %87, %39 : vector<8x256xf32>
    %90 = arith.addf %88, %89 : vector<8x256xf32>
    %91 = tpu.concatenate %75, %85, %80, %90 in 0 : vector<8x256xf32>, vector<8x256xf32>, vector<8x256xf32>, vector<8x256xf32> -> vector<32x256xf32>
    %cst_33 = arith.constant dense<0.000000e+00> : vector<16x256xf32>
    %92 = tpu.matmul %10, %91, %cst_33 {dimension_numbers = #tpu.dot_dimension_numbers<[1], [0], [0], [1], [0, 0, 1, 1], [], []>} : vector<16x32xf32>, vector<32x256xf32>, vector<16x256xf32> -> vector<16x256xf32>
    %93 = vector.extract_strided_slice %92 {offsets = [0, 0], sizes = [8, 256], strides = [1, 1]} : vector<16x256xf32> to vector<8x256xf32>
    %c0_34 = arith.constant 0 : index
    %c0_35 = arith.constant 0 : index
    %c0_36 = arith.constant 0 : index
    %94 = vector.load %arg4[%c0_34, %c0_35, %c0_36] : memref<1x8x256xf32, #tpu.memory_space<vmem>>, vector<1x8x256xf32>
    %95 = vector.shape_cast %94 : vector<1x8x256xf32> to vector<8x256xf32>
    %96 = vector.shape_cast %93 : vector<8x256xf32> to vector<1x8x256xf32>
    tpu.vector_store %arg4[%c0_34, %c0_35, %c0_36], %96 {strides = array<i32>} : memref<1x8x256xf32, #tpu.memory_space<vmem>>, vector<1x8x256xf32>,
    %97 = vector.extract_strided_slice %92 {offsets = [8, 0], sizes = [8, 256], strides = [1, 1]} : vector<16x256xf32> to vector<8x256xf32>
    %c0_37 = arith.constant 0 : index
    %c0_38 = arith.constant 0 : index
    %c0_39 = arith.constant 0 : index
    %98 = vector.load %arg5[%c0_37, %c0_38, %c0_39] : memref<1x8x256xf32, #tpu.memory_space<vmem>>, vector<1x8x256xf32>
    %99 = vector.shape_cast %98 : vector<1x8x256xf32> to vector<8x256xf32>
    %100 = vector.shape_cast %97 : vector<8x256xf32> to vector<1x8x256xf32>
    tpu.vector_store %arg5[%c0_37, %c0_38, %c0_39], %100 {strides = array<i32>} : memref<1x8x256xf32, #tpu.memory_space<vmem>>, vector<1x8x256xf32>,
    return
  }
  func.func @transform_0(%arg0: i32) -> (i32, i32, i32) {
    %c0_i32 = arith.constant 0 : i32
    %c0_i32_0 = arith.constant 0 : i32
    %c0_i32_1 = arith.constant 0 : i32
    return %arg0, %c0_i32, %c0_i32_0 : i32, i32, i32
  }
  func.func @transform_1(%arg0: i32) -> (i32, i32) {
    %c0_i32 = arith.constant 0 : i32
    %c0_i32_0 = arith.constant 0 : i32
    %c0_i32_1 = arith.constant 0 : i32
    return %c0_i32, %c0_i32_0 : i32, i32
  }
  func.func @transform_2(%arg0: i32) -> (i32, i32) {
    %c0_i32 = arith.constant 0 : i32
    %c0_i32_0 = arith.constant 0 : i32
    %c0_i32_1 = arith.constant 0 : i32
    return %c0_i32, %c0_i32_0 : i32, i32
  }
  func.func @transform_3(%arg0: i32) -> (i32, i32, i32) {
    %c0_i32 = arith.constant 0 : i32
    %c0_i32_0 = arith.constant 0 : i32
    %c0_i32_1 = arith.constant 0 : i32
    return %arg0, %c0_i32, %c0_i32_0 : i32, i32, i32
  }
  func.func @transform_4(%arg0: i32) -> (i32, i32, i32) {
    %c0_i32 = arith.constant 0 : i32
    %c0_i32_0 = arith.constant 0 : i32
    %c0_i32_1 = arith.constant 0 : i32
    return %arg0, %c0_i32, %c0_i32_0 : i32, i32, i32
  }
}

module attributes {stable_mosaic.version = 11 : i64} {
  func.func @mh_attention_kernel(%arg0: i32, %arg1: memref<1x8x256xf32, #tpu.memory_space<vmem>>, %arg2: memref<96x8xf32, #tpu.memory_space<vmem>>, %arg3: memref<16x32xf32, #tpu.memory_space<vmem>>, %arg4: memref<1x8x256xf32, #tpu.memory_space<vmem>>, %arg5: memref<1x8x256xf32, #tpu.memory_space<vmem>>, %arg6: memref<11x512xf32, #tpu.memory_space<vmem>>) attributes {dimension_semantics = [#tpu.dimension_semantics<parallel>], iteration_bounds = array<i64: 2>, scalar_prefetch = 0 : i64, scratch_operands = 1 : i64, tpu.core_type = #tpu.core_type<tc>, window_params = [{transform_indices = @transform_0, window_bounds = array<i64: 1, 8, 256>}, {pipeline_mode = #tpu.pipeline_mode<synchronous>, transform_indices = @transform_1, window_bounds = array<i64: 96, 8>}, {pipeline_mode = #tpu.pipeline_mode<synchronous>, transform_indices = @transform_2, window_bounds = array<i64: 16, 32>}, {transform_indices = @transform_3, window_bounds = array<i64: 1, 8, 256>}, {transform_indices = @transform_4, window_bounds = array<i64: 1, 8, 256>}]} {
    %0 = tpu.iota {dimensions = array<i32: 1>} : vector<4x512xi32>
    %c196_i32 = arith.constant 196 : i32
    %1 = vector.broadcast %c196_i32 : i32 to vector<4x512xi32>
    %2 = arith.cmpi slt, %0, %1 : vector<4x512xi32>
    %c256_i32 = arith.constant 256 : i32
    %3 = vector.broadcast %c256_i32 : i32 to vector<4x512xi32>
    %4 = arith.cmpi sge, %0, %3 : vector<4x512xi32>
    %c452_i32 = arith.constant 452 : i32
    %5 = vector.broadcast %c452_i32 : i32 to vector<4x512xi32>
    %6 = arith.cmpi slt, %0, %5 : vector<4x512xi32>
    %7 = arith.andi %4, %6 : vector<4x512xi1>
    %8 = arith.ori %2, %7 : vector<4x512xi1>
    %c0 = arith.constant 0 : index
    %c0_0 = arith.constant 0 : index
    %9 = vector.load %arg2[%c0, %c0_0] : memref<96x8xf32, #tpu.memory_space<vmem>>, vector<96x8xf32>
    %c0_1 = arith.constant 0 : index
    %c0_2 = arith.constant 0 : index
    %10 = vector.load %arg3[%c0_1, %c0_2] : memref<16x32xf32, #tpu.memory_space<vmem>>, vector<16x32xf32>
    %c0_3 = arith.constant 0 : index
    %c0_4 = arith.constant 0 : index
    %c0_5 = arith.constant 0 : index
    %11 = vector.load %arg1[%c0_3, %c0_4, %c0_5] : memref<1x8x256xf32, #tpu.memory_space<vmem>>, vector<1x8x256xf32>
    %12 = vector.shape_cast %11 : vector<1x8x256xf32> to vector<8x256xf32>
    %cst = arith.constant dense<0.000000e+00> : vector<96x256xf32>
    %13 = tpu.matmul %9, %12, %cst {dimension_numbers = #tpu.dot_dimension_numbers<[1], [0], [0], [1], [0, 0, 1, 1], [], []>} : vector<96x8xf32>, vector<8x256xf32>, vector<96x256xf32> -> vector<96x256xf32>
    %14 = vector.extract_strided_slice %13 {offsets = [0, 0], sizes = [8, 256], strides = [1, 1]} : vector<96x256xf32> to vector<8x256xf32>
    %15 = vector.extract_strided_slice %13 {offsets = [8, 0], sizes = [8, 256], strides = [1, 1]} : vector<96x256xf32> to vector<8x256xf32>
    %16 = vector.extract_strided_slice %13 {offsets = [16, 0], sizes = [8, 256], strides = [1, 1]} : vector<96x256xf32> to vector<8x256xf32>
    %17 = vector.extract_strided_slice %13 {offsets = [24, 0], sizes = [8, 256], strides = [1, 1]} : vector<96x256xf32> to vector<8x256xf32>
    %18 = vector.extract_strided_slice %13 {offsets = [32, 0], sizes = [8, 256], strides = [1, 1]} : vector<96x256xf32> to vector<8x256xf32>
    %19 = vector.extract_strided_slice %13 {offsets = [40, 0], sizes = [8, 256], strides = [1, 1]} : vector<96x256xf32> to vector<8x256xf32>
    %20 = arith.mulf %14, %15 : vector<8x256xf32>
    %cst_6 = arith.constant dense<0.000000e+00> : vector<256xf32>
    %21 = vector.multi_reduction <add>, %20, %cst_6 [0] : vector<8x256xf32> to vector<256xf32>
    %22 = vector.shape_cast %21 : vector<256xf32> to vector<1x256xf32>
    %23 = arith.mulf %14, %18 : vector<8x256xf32>
    %cst_7 = arith.constant dense<0.000000e+00> : vector<256xf32>
    %24 = vector.multi_reduction <add>, %23, %cst_7 [0] : vector<8x256xf32> to vector<256xf32>
    %25 = vector.shape_cast %24 : vector<256xf32> to vector<1x256xf32>
    %26 = arith.mulf %17, %15 : vector<8x256xf32>
    %cst_8 = arith.constant dense<0.000000e+00> : vector<256xf32>
    %27 = vector.multi_reduction <add>, %26, %cst_8 [0] : vector<8x256xf32> to vector<256xf32>
    %28 = vector.shape_cast %27 : vector<256xf32> to vector<1x256xf32>
    %29 = arith.mulf %17, %18 : vector<8x256xf32>
    %cst_9 = arith.constant dense<0.000000e+00> : vector<256xf32>
    %30 = vector.multi_reduction <add>, %29, %cst_9 [0] : vector<8x256xf32> to vector<256xf32>
    %31 = vector.shape_cast %30 : vector<256xf32> to vector<1x256xf32>
    %32 = tpu.concatenate %22, %25 in 1 : vector<1x256xf32>, vector<1x256xf32> -> vector<1x512xf32>
    %33 = tpu.concatenate %28, %31 in 1 : vector<1x256xf32>, vector<1x256xf32> -> vector<1x512xf32>
    %34 = vector.extract_strided_slice %13 {offsets = [48, 0], sizes = [8, 256], strides = [1, 1]} : vector<96x256xf32> to vector<8x256xf32>
    %35 = vector.extract_strided_slice %13 {offsets = [56, 0], sizes = [8, 256], strides = [1, 1]} : vector<96x256xf32> to vector<8x256xf32>
    %36 = vector.extract_strided_slice %13 {offsets = [64, 0], sizes = [8, 256], strides = [1, 1]} : vector<96x256xf32> to vector<8x256xf32>
    %37 = vector.extract_strided_slice %13 {offsets = [72, 0], sizes = [8, 256], strides = [1, 1]} : vector<96x256xf32> to vector<8x256xf32>
    %38 = vector.extract_strided_slice %13 {offsets = [80, 0], sizes = [8, 256], strides = [1, 1]} : vector<96x256xf32> to vector<8x256xf32>
    %39 = vector.extract_strided_slice %13 {offsets = [88, 0], sizes = [8, 256], strides = [1, 1]} : vector<96x256xf32> to vector<8x256xf32>
    %40 = arith.mulf %34, %35 : vector<8x256xf32>
    %cst_10 = arith.constant dense<0.000000e+00> : vector<256xf32>
    %41 = vector.multi_reduction <add>, %40, %cst_10 [0] : vector<8x256xf32> to vector<256xf32>
    %42 = vector.shape_cast %41 : vector<256xf32> to vector<1x256xf32>
    %43 = arith.mulf %34, %38 : vector<8x256xf32>
    %cst_11 = arith.constant dense<0.000000e+00> : vector<256xf32>
    %44 = vector.multi_reduction <add>, %43, %cst_11 [0] : vector<8x256xf32> to vector<256xf32>
    %45 = vector.shape_cast %44 : vector<256xf32> to vector<1x256xf32>
    %46 = arith.mulf %37, %35 : vector<8x256xf32>
    %cst_12 = arith.constant dense<0.000000e+00> : vector<256xf32>
    %47 = vector.multi_reduction <add>, %46, %cst_12 [0] : vector<8x256xf32> to vector<256xf32>
    %48 = vector.shape_cast %47 : vector<256xf32> to vector<1x256xf32>
    %49 = arith.mulf %37, %38 : vector<8x256xf32>
    %cst_13 = arith.constant dense<0.000000e+00> : vector<256xf32>
    %50 = vector.multi_reduction <add>, %49, %cst_13 [0] : vector<8x256xf32> to vector<256xf32>
    %51 = vector.shape_cast %50 : vector<256xf32> to vector<1x256xf32>
    %52 = tpu.concatenate %42, %45 in 1 : vector<1x256xf32>, vector<1x256xf32> -> vector<1x512xf32>
    %53 = tpu.concatenate %48, %51 in 1 : vector<1x256xf32>, vector<1x256xf32> -> vector<1x512xf32>
    %54 = tpu.concatenate %32, %33, %52, %53 in 0 : vector<1x512xf32>, vector<1x512xf32>, vector<1x512xf32>, vector<1x512xf32> -> vector<4x512xf32>
    %cst_14 = arith.constant 0.353553385 : f32
    %55 = vector.broadcast %cst_14 : f32 to vector<4x512xf32>
    %56 = arith.mulf %54, %55 : vector<4x512xf32>
    %cst_15 = arith.constant -1.000000e+30 : f32
    %57 = vector.broadcast %cst_15 : f32 to vector<4x512xf32>
    %58 = arith.select %8, %56, %57 : vector<4x512xi1>, vector<4x512xf32>
    %cst_16 = arith.constant dense<0xFF800000> : vector<4xf32>
    %59 = vector.multi_reduction <maximumf>, %58, %cst_16 [1] : vector<4x512xf32> to vector<4xf32>
    %60 = vector.shape_cast %59 : vector<4xf32> to vector<4x1xf32>
    %61 = vector.broadcast %60 : vector<4x1xf32> to vector<4x512xf32>
    %62 = arith.subf %58, %61 : vector<4x512xf32>
    %63 = math.exp %62 : vector<4x512xf32>
    %cst_17 = arith.constant dense<0.000000e+00> : vector<4xf32>
    %64 = vector.multi_reduction <add>, %63, %cst_17 [1] : vector<4x512xf32> to vector<4xf32>
    %65 = vector.shape_cast %64 : vector<4xf32> to vector<4x1xf32>
    %cst_18 = arith.constant 1.000000e+00 : f32
    %66 = vector.broadcast %cst_18 : f32 to vector<4x1xf32>
    %67 = arith.divf %66, %65 : vector<4x1xf32>
    %68 = vector.broadcast %67 : vector<4x1xf32> to vector<4x512xf32>
    %69 = arith.mulf %63, %68 : vector<4x512xf32>
    %70 = vector.extract_strided_slice %69 {offsets = [0, 0], sizes = [1, 256], strides = [1, 1]} : vector<4x512xf32> to vector<1x256xf32>
    %71 = vector.extract_strided_slice %69 {offsets = [0, 256], sizes = [1, 256], strides = [1, 1]} : vector<4x512xf32> to vector<1x256xf32>
    %72 = vector.broadcast %70 : vector<1x256xf32> to vector<8x256xf32>
    %73 = arith.mulf %72, %16 : vector<8x256xf32>
    %74 = vector.broadcast %71 : vector<1x256xf32> to vector<8x256xf32>
    %75 = arith.mulf %74, %19 : vector<8x256xf32>
    %76 = arith.addf %73, %75 : vector<8x256xf32>
    %77 = vector.extract_strided_slice %69 {offsets = [1, 0], sizes = [1, 256], strides = [1, 1]} : vector<4x512xf32> to vector<1x256xf32>
    %78 = vector.extract_strided_slice %69 {offsets = [1, 256], sizes = [1, 256], strides = [1, 1]} : vector<4x512xf32> to vector<1x256xf32>
    %79 = vector.broadcast %77 : vector<1x256xf32> to vector<8x256xf32>
    %80 = arith.mulf %79, %16 : vector<8x256xf32>
    %81 = vector.broadcast %78 : vector<1x256xf32> to vector<8x256xf32>
    %82 = arith.mulf %81, %19 : vector<8x256xf32>
    %83 = arith.addf %80, %82 : vector<8x256xf32>
    %84 = vector.extract_strided_slice %69 {offsets = [2, 0], sizes = [1, 256], strides = [1, 1]} : vector<4x512xf32> to vector<1x256xf32>
    %85 = vector.extract_strided_slice %69 {offsets = [2, 256], sizes = [1, 256], strides = [1, 1]} : vector<4x512xf32> to vector<1x256xf32>
    %86 = vector.broadcast %84 : vector<1x256xf32> to vector<8x256xf32>
    %87 = arith.mulf %86, %36 : vector<8x256xf32>
    %88 = vector.broadcast %85 : vector<1x256xf32> to vector<8x256xf32>
    %89 = arith.mulf %88, %39 : vector<8x256xf32>
    %90 = arith.addf %87, %89 : vector<8x256xf32>
    %91 = vector.extract_strided_slice %69 {offsets = [3, 0], sizes = [1, 256], strides = [1, 1]} : vector<4x512xf32> to vector<1x256xf32>
    %92 = vector.extract_strided_slice %69 {offsets = [3, 256], sizes = [1, 256], strides = [1, 1]} : vector<4x512xf32> to vector<1x256xf32>
    %93 = vector.broadcast %91 : vector<1x256xf32> to vector<8x256xf32>
    %94 = arith.mulf %93, %36 : vector<8x256xf32>
    %95 = vector.broadcast %92 : vector<1x256xf32> to vector<8x256xf32>
    %96 = arith.mulf %95, %39 : vector<8x256xf32>
    %97 = arith.addf %94, %96 : vector<8x256xf32>
    %98 = tpu.concatenate %76, %90, %83, %97 in 0 : vector<8x256xf32>, vector<8x256xf32>, vector<8x256xf32>, vector<8x256xf32> -> vector<32x256xf32>
    %cst_19 = arith.constant dense<0.000000e+00> : vector<16x256xf32>
    %99 = tpu.matmul %10, %98, %cst_19 {dimension_numbers = #tpu.dot_dimension_numbers<[1], [0], [0], [1], [0, 0, 1, 1], [], []>} : vector<16x32xf32>, vector<32x256xf32>, vector<16x256xf32> -> vector<16x256xf32>
    %100 = vector.extract_strided_slice %99 {offsets = [0, 0], sizes = [8, 256], strides = [1, 1]} : vector<16x256xf32> to vector<8x256xf32>
    %c0_20 = arith.constant 0 : index
    %c0_21 = arith.constant 0 : index
    %c0_22 = arith.constant 0 : index
    %101 = vector.load %arg4[%c0_20, %c0_21, %c0_22] : memref<1x8x256xf32, #tpu.memory_space<vmem>>, vector<1x8x256xf32>
    %102 = vector.shape_cast %101 : vector<1x8x256xf32> to vector<8x256xf32>
    %103 = vector.shape_cast %100 : vector<8x256xf32> to vector<1x8x256xf32>
    tpu.vector_store %arg4[%c0_20, %c0_21, %c0_22], %103 {strides = array<i32>} : memref<1x8x256xf32, #tpu.memory_space<vmem>>, vector<1x8x256xf32>,
    %104 = vector.extract_strided_slice %99 {offsets = [8, 0], sizes = [8, 256], strides = [1, 1]} : vector<16x256xf32> to vector<8x256xf32>
    %c0_23 = arith.constant 0 : index
    %c0_24 = arith.constant 0 : index
    %c0_25 = arith.constant 0 : index
    %105 = vector.load %arg5[%c0_23, %c0_24, %c0_25] : memref<1x8x256xf32, #tpu.memory_space<vmem>>, vector<1x8x256xf32>
    %106 = vector.shape_cast %105 : vector<1x8x256xf32> to vector<8x256xf32>
    %107 = vector.shape_cast %104 : vector<8x256xf32> to vector<1x8x256xf32>
    tpu.vector_store %arg5[%c0_23, %c0_24, %c0_25], %107 {strides = array<i32>} : memref<1x8x256xf32, #tpu.memory_space<vmem>>, vector<1x8x256xf32>,
    return
  }
  func.func @transform_0(%arg0: i32) -> (i32, i32, i32) {
    %c0_i32 = arith.constant 0 : i32
    %c0_i32_0 = arith.constant 0 : i32
    %c0_i32_1 = arith.constant 0 : i32
    return %arg0, %c0_i32, %c0_i32_0 : i32, i32, i32
  }
  func.func @transform_1(%arg0: i32) -> (i32, i32) {
    %c0_i32 = arith.constant 0 : i32
    %c0_i32_0 = arith.constant 0 : i32
    %c0_i32_1 = arith.constant 0 : i32
    return %c0_i32, %c0_i32_0 : i32, i32
  }
  func.func @transform_2(%arg0: i32) -> (i32, i32) {
    %c0_i32 = arith.constant 0 : i32
    %c0_i32_0 = arith.constant 0 : i32
    %c0_i32_1 = arith.constant 0 : i32
    return %c0_i32, %c0_i32_0 : i32, i32
  }
  func.func @transform_3(%arg0: i32) -> (i32, i32, i32) {
    %c0_i32 = arith.constant 0 : i32
    %c0_i32_0 = arith.constant 0 : i32
    %c0_i32_1 = arith.constant 0 : i32
    return %arg0, %c0_i32, %c0_i32_0 : i32, i32, i32
  }
  func.func @transform_4(%arg0: i32) -> (i32, i32, i32) {
    %c0_i32 = arith.constant 0 : i32
    %c0_i32_0 = arith.constant 0 : i32
    %c0_i32_1 = arith.constant 0 : i32
    return %arg0, %c0_i32, %c0_i32_0 : i32, i32, i32
  }
}

</mosaic_0001>

<bundles_post_ra>
// kernel: tpu_custom_call.1
= control target key start
LH: loop header
LB: loop body
LE: loop exit
PB: predicated region body
PF: predicated region fallthrough
CT: control target
= control target key end

     0   :  { %10 = vsyncpa [#allocation4], 0  ;;  %s1293_s0 = inlined_call_operand.vmem [shape: f32[2,8,256], index: 0, kind: input, shape index: {}]   ;;  %s1294_s1 = inlined_call_operand.vmem [shape: f32[96,8], index: 1, kind: input, shape index: {}]   ;;  %s1295_s2 = inlined_call_operand.vmem [shape: f32[16,32], index: 2, kind: input, shape index: {}]   ;;  %s1296_s3 = inlined_call_operand.hbm [shape: f32[2,8,256], index: 3, kind: output, shape index: {0}]   ;;  %s1297_s4 = inlined_call_operand.hbm [shape: f32[2,8,256], index: 4, kind: output, shape index: {1}]  }
   0x1   :  { %12 = vsyncpa [#allocation4 + $0x1], 0 }
   0x2   :  { %13 = vsyncpa [#allocation6], 0 }
   0x3   :  { %15 = vsyncpa [#allocation6 + $0x1], 0  ;;  %s1062_s15 = smov 0   ;;  %s1064_s16 = smov 0  }
   0x4   :  { %s1066_s17 = smov 0   ;;  %s1068_s18 = smov 0  }
   0x5 LB: > { %s1083_s19 = sadd.s32 4294967295, %s1035_s18   ;;  %s838_s20 = sadd.s32 4294967294, %s1035_s18   ;;  %s1035_s18 = sphi %s1068_s18, %s1303_s18   ;;  %s1031_s17 = sphi %s1066_s17, %s1302_s17   ;;  %s1027_s16 = sphi %s1064_s16, %s1301_s16   ;;  %s1023_s15 = sphi %s1062_s15, %s1300_s15  }
   0x6   : > { %s1087_s21 = sadd.s32 1, %s1035_s18   ;;  %s96_s22 = sadd.s32 1, %s1031_s17 }
   0x7   : > { %s93_s23 = ssub.s32 %s1035_s18, %s1087_s21  ;;  %p106_p0 = scmp.ne.s32.totalorder %s1031_s17, %s1027_s16 }
   0x8   : > { %p94_p1 = scmp.eq.s32.totalorder %s93_s23, 0  ;;  %p107_p2 = scmp.eq.s32.totalorder %s1083_s19, 1 }
   0x9   : > { %p112_p3 = scmp.ne.s32.totalorder %s1027_s16, %s1023_s15  ;;  %p113_p4 = scmp.eq.s32.totalorder %s838_s20, 1 }
   0xa   : > { %s1098_s24 = scalar_select %p94_p1, %s1031_s17, %s96_s22  }
   0xb   : > { %p1100_p5 = por %p107_p2, %p106_p0  ;;  %p1104_p6 = por %p113_p4, %p112_p3 }
   0xc   : > { %p841_p7 = scmp.ge.s32.totalorder %s1035_s18, 1  ;;  %p171_p8 = scmp.lt.s32.totalorder %s1035_s18, 3 }
   0xe   : > { %p172_p9 = pnand %p841_p7, %p171_p8 }
   0xf   : > { %p202_p10 = scmp.lt.s32.totalorder (!%p172_p9), %s1083_s19, 1  ;;  %s1244_s23 = sand.u32 (!%p172_p9), 1, %s1027_s16  }
  0x10   : > { %175 = sbr.rel (%p172_p9) target bundleno = 663 (0x297), region = 32  ;;  %s961_s22 = scalar_lea.hbm (!%p172_p9), %s1296_s3, 32 }
  0x15   : > { %s203_s27 = scalar_select %p202_p10, %s1083_s19, 1  ;;  %v232_v0 = vld [vmem:[%s1294_s1] sm:$0xff]  ;;  %vm248_vm0 = vcmask 64512   ;;  %v239_v3 = vld [vmem:[%s1294_s1 + $0x38] sm:$0xff]  ;;  %v233_v4 = vld [vmem:[%s1294_s1 + $0x8] sm:$0xff]  ;;  %vm539_vm1 = vcmask 1040384  }
  0x16   : > { %v240_v5 = vld [vmem:[%s1294_s1 + $0x40] sm:$0xff]  ;;  %v234_v6 = vld [vmem:[%s1294_s1 + $0x10] sm:$0xff]  ;;  %v241_v7 = vld [vmem:[%s1294_s1 + $0x48] sm:$0xff]  ;;  %vm544_vm4 = vcmask 1041408   ;;  %vm549_vm5 = vcmask 1042432   ;;  %vm562_vm6 = vcmask 1043456  }
  0x17   : > { %s882_s28 = sshll.u32 %s203_s27, 4  ;;  %v235_v8 = vld [vmem:[%s1294_s1 + $0x18] sm:$0xff]  ;;  %v242_v9 = vld [vmem:[%s1294_s1 + $0x50] sm:$0xff]  ;;  %v236_v10 = vld [vmem:[%s1294_s1 + $0x20] sm:$0xff]  ;;  %vm652_vm11 = vcmask 261120   ;;  %s883_s27 = sshll.u32 %s1083_s19, 4 }
  0x18   : > { %s206_s5 = scalar_lea.vmem %s1293_s0, %s882_s28  ;;  %v237_v11 = vld [vmem:[%s1294_s1 + $0x28] sm:$0xff]  ;;  %v238_v12 = vld [vmem:[%s1294_s1 + $0x30] sm:$0xff]  ;;  %s842_s28 = sshll.u32 %s1244_s23, 4 }
  0x19   : > { %v246_v1 = vld [vmem:[%s206_s5] sm:$0xff]  ;;  %v247_v2 = vld [vmem:[%s206_s5 + $0x8] sm:$0xff]  ;;  %s726_s5 = scalar_lea.hbm %s1296_s3, %s883_s27  ;;  %s194_s6 = scalar_lea.vmem [#allocation3], %s842_s28 }
  0x1a   : > { %300 = vmatpush.msra.mxu0 %v246_v1  ;;  %885 = vmatpush.msra.mxu2 %v246_v1  ;;  %s728_s7 = sshll.u32 %s194_s6, 4  ;;  %s730_s8 = sshll.u32 %s726_s5, 4  ;;  %s729_s7 = int_to_ptr.vmem [resolvable:$true] %s728_s7  ;;  %s731_s8 = int_to_ptr.hbm [resolvable:$true] %s730_s8 }
  0x1b   : > { %353 = vmatpush.msra.mxu1 %v247_v2  ;;  %886 = vmatpush.msra.mxu3 %v247_v2  ;;  %s741_s11 = scalar_lea.hbm %s1297_s4, %s883_s27  ;;  %s710_s19 = scalar_lea.sflag [#allocation4], %s1244_s23 }
  0x1c   : > { %846 = vmatmul.msk.f32.vlgmr.msra.gmra.mxu0 %vm248_vm0, %v232_v0  ;;  %853 = vmatmul.msk.f32.vlgmr.msra.gmra.mxu2 %vm248_vm0, %v239_v3  ;;  %s955_s12 = sshra.s32 %s731_s8, 4  ;;  %s956_s12 = int_to_ptr.hbm [resolvable:$true] %s955_s12 }
  0x1d   : > { %858 = vmatmul.msk.f32.vlgmr.msra.gmra.mxu1 %vm248_vm0, %v232_v0  ;;  %865 = vmatmul.msk.f32.vlgmr.msra.gmra.mxu3 %vm248_vm0, %v239_v3  ;;  %s957_s13 = scalar_lea.hbm %s956_s12, 16  ;;  %p962_p0 = scmp.lt.s32.totalorder %s956_s12, %s1296_s3 }
  0x1e   : > { %p958_p11 = scmp.ne.s32.totalorder %s956_s12, %s957_s13  ;;  %p963_p1 = scmp.lt.s32.totalorder %s961_s22, %s957_s13 }
  0x20   : > { %p959_p12 = pnand %p958_p11, %p1100_p5  ;;  %p964_p2 = por %p963_p1, %p962_p0 }
  0x22   : > { %p960_p13 = pneg %p959_p12 }
  0x24   : > { %847 = vmatmul.msk.f32.gmra.mxu0 %vm248_vm0, %v233_v4  ;;  %854 = vmatmul.msk.f32.gmra.mxu2 %vm248_vm0, %v240_v5  ;;  %p965_p3 = pnand %p964_p2, %p960_p13 }
  0x25   : > { %859 = vmatmul.msk.f32.gmra.mxu1 %vm248_vm0, %v233_v4  ;;  %866 = vmatmul.msk.f32.gmra.mxu3 %vm248_vm0, %v240_v5 }
  0x2c   : > { %848 = vmatmul.msk.f32.gmra.mxu0 %vm248_vm0, %v234_v6  ;;  %855 = vmatmul.msk.f32.gmra.mxu2 %vm248_vm0, %v241_v7 }
  0x2d   : > { %860 = vmatmul.msk.f32.gmra.mxu1 %vm248_vm0, %v234_v6  ;;  %867 = vmatmul.msk.f32.gmra.mxu3 %vm248_vm0, %v241_v7 }
  0x34   : > { %849 = vmatmul.msk.f32.gmra.mxu0 %vm248_vm0, %v235_v8  ;;  %856 = vmatmul.msk.f32.gmra.mxu2 %vm248_vm0, %v242_v9 }
  0x35   : > { %861 = vmatmul.msk.f32.gmra.mxu1 %vm248_vm0, %v235_v8  ;;  %868 = vmatmul.msk.f32.gmra.mxu3 %vm248_vm0, %v242_v9 }
  0x3c   : > { %850 = vmatmul.msk.f32.gmra.mxu0 %vm248_vm0, %v236_v10 }
  0x3d   : > { %862 = vmatmul.msk.f32.gmra.mxu1 %vm248_vm0, %v236_v10 }
  0x44   : > { %851 = vmatmul.msk.f32.gmra.mxu0 %vm248_vm0, %v237_v11 }
  0x45   : > { %863 = vmatmul.msk.f32.gmra.mxu1 %vm248_vm0, %v237_v11 }
  0x4c   : > { %852 = vmatmul.msk.f32.gmra.mxu0 %vm248_vm0, %v238_v12 }
  0x4d   : > { %864 = vmatmul.msk.f32.gmra.mxu1 %vm248_vm0, %v238_v12 }
  0x99   : > { %v302_v13 = vpop.f32.mrf.mxu0 }
  0x9a   : > { %v355_v14 = vpop.f32.mrf.mxu1 }
  0x9f   : > { %v1170_v15 = vpop.f32.mrf.mxu2 }
  0xa0   : > { %v1172_v16 = vpop.f32.mrf.mxu3 }
  0xa1   : > { %v305_v17 = vpop.f32.mrf.mxu0 }
  0xa2   : > { %v358_v18 = vpop.f32.mrf.mxu1  ;;  %v391_v23 = vmul.f32 %v305_v17, %v302_v13 }
  0xa3   : > { %v392_v25 = vmul.f32 %v358_v18, %v355_v14 }
  0xa4   : > { %v393_v33 = vrot.slane %v391_v23, 4 }
  0xa5   : > { %v399_v36 = vrot.slane %v392_v25, 4 }
  0xa6   : > { %v394_v42 = vadd.f32 %v393_v33, %v391_v23 }
  0xa7   : > { %v1174_v19 = vpop.f32.mrf.mxu2  ;;  %v400_v43 = vadd.f32 %v399_v36, %v392_v25  ;;  %v207_v36 = vlaneseq }
  0xa8   : > { %v1176_v20 = vpop.f32.mrf.mxu3  ;;  %v395_v52 = vrot.slane %v394_v42, 2 }
  0xa9   : > { %v1178_v21 = vpop.f32.mrf.mxu0  ;;  %v401_v56 = vrot.slane %v400_v43, 2 }
  0xaa   : > { %v1180_v22 = vpop.f32.mrf.mxu1  ;;  %v396_v2 = vadd.f32 %v395_v52, %v394_v42 }
  0xab   : > { %v402_v4 = vadd.f32 %v401_v56, %v400_v43  ;;  %v208_v56 = vand.u32 127, %v207_v36 }
  0xaf   : > { %v329_v24 = vpop.f32.mrf.mxu2 }
  0xb0   : > { %v475_v26 = vmul.f32 %v329_v24, %v1170_v15  ;;  %v382_v27 = vpop.f32.mrf.mxu3 }
  0xb1   : > { %v476_v28 = vmul.f32 %v382_v27, %v1172_v16  ;;  %v311_v29 = vpop.f32.mrf.mxu0 }
  0xb2   : > { %v477_v30 = vrot.slane %v475_v26, 4  ;;  %v419_v31 = vmul.f32 %v311_v29, %v305_v17  ;;  %v364_v32 = vpop.f32.mrf.mxu1 }
  0xb3   : > { %v483_v34 = vrot.slane %v476_v28, 4  ;;  %v420_v35 = vmul.f32 %v364_v32, %v358_v18  ;;  %v397_v18 = vrot.slane %v396_v2, 1 }
  0xb4   : > { %v478_v37 = vadd.f32 %v477_v30, %v475_v26  ;;  %v421_v38 = vrot.slane %v419_v31, 4 }
  0xb5   : > { %v484_v39 = vadd.f32 %v483_v34, %v476_v28  ;;  %v427_v40 = vrot.slane %v420_v35, 4  ;;  %v398_v34 = vadd.f32 %v397_v18, %v396_v2 }
  0xb6   : > { %v422_v41 = vadd.f32 %v421_v38, %v419_v31  ;;  %v479_v44 = vrot.slane %v478_v37, 2 }
  0xb7   : > { %v428_v45 = vadd.f32 %v427_v40, %v420_v35  ;;  %v485_v46 = vrot.slane %v484_v39, 2  ;;  %v332_v51 = vpop.f32.mrf.mxu2 }
  0xb8   : > { %v423_v47 = vrot.slane %v422_v41, 2  ;;  %v385_v55 = vpop.f32.mrf.mxu3  ;;  %v480_v57 = vadd.f32 %v479_v44, %v478_v37  ;;  %v489_v63 = vmul.f32 %v332_v51, %v329_v24  ;;  %v403_v24 = vrot.slane %v402_v4, 1 }
  0xb9   : > { %v314_v48 = vpop.f32.mrf.mxu0  ;;  %v429_v58 = vrot.slane %v428_v45, 2  ;;  %v486_v60 = vadd.f32 %v485_v46, %v484_v39  ;;  %v490_v1 = vmul.f32 %v385_v55, %v382_v27 }
  0xba   : > { %v433_v49 = vmul.f32 %v314_v48, %v311_v29  ;;  %v367_v50 = vpop.f32.mrf.mxu1  ;;  %v405_v53 = vmul.f32 %v314_v48, %v302_v13  ;;  %v424_v61 = vadd.f32 %v423_v47, %v422_v41  ;;  %v481_v5 = vrot.slane %v480_v57, 1 }
  0xbb   : > { %v434_v54 = vmul.f32 %v367_v50, %v364_v32  ;;  %v406_v59 = vmul.f32 %v367_v50, %v355_v14  ;;  %v430_v6 = vadd.f32 %v429_v58, %v428_v45  ;;  %v487_v8 = vrot.slane %v486_v60, 1 }
  0xbc   : > { %v435_v62 = vrot.slane %v433_v49, 4  ;;  %v407_v3 = vrot.slane %v405_v53, 4  ;;  %v425_v9 = vrot.slane %v424_v61, 1  ;;  %v491_v11 = vrot.slane %v489_v63, 4 }
  0xbd   : > { %v441_v0 = vrot.slane %v434_v54, 4  ;;  %v413_v7 = vrot.slane %v406_v59, 4  ;;  %v497_v14 = vrot.slane %v490_v1, 4  ;;  %v1188_v25 = vadd.f32 %v481_v5, %v480_v57 }
  0xbe   : > { %v436_v10 = vadd.f32 %v435_v62, %v433_v49  ;;  %v408_v23 = vadd.f32 %v407_v3, %v405_v53  ;;  %v431_v26 = vrot.slane %v430_v6, 1  ;;  %v1190_v28 = vadd.f32 %v487_v8, %v486_v60 }
  0xbf   : > { %v442_v13 = vadd.f32 %v441_v0, %v434_v54  ;;  %v414_v27 = vadd.f32 %v413_v7, %v406_v59  ;;  %v426_v29 = vadd.f32 %v425_v9, %v424_v61  ;;  %v492_v31 = vadd.f32 %v491_v11, %v489_v63 }
  0xc0   : > { %v437_v30 = vrot.slane %v436_v10, 2  ;;  %v498_v33 = vadd.f32 %v497_v14, %v490_v1  ;;  %v409_v35 = vrot.slane %v408_v23, 2  ;;  %v1192_v37 = vadd.f32 %v403_v24, %v402_v4 }
  0xc1   : > { %v1184_v12 = vpop.f32.mrf.mxu0  ;;  %v443_v32 = vrot.slane %v442_v13, 2  ;;  %v531_v38 = vrot.slane %v1188_v25, 5  ;;  %v1195_v39 = vadd.f32 %v431_v26, %v430_v6  ;;  %v415_v40 = vrot.slane %v414_v27, 2 }
  0xc2   : > { %v1186_v17 = vpop.f32.mrf.mxu1  ;;  %v532_v41 = vrot.slane %v1190_v28, 5  ;;  %v507_v42 = vrot.slane %v426_v29, 7  ;;  %v438_v43 = vadd.f32 %v437_v30, %v436_v10  ;;  %v493_v44 = vrot.slane %v492_v31, 2 }
  0xc3   : > { %v444_v46 = vadd.f32 %v443_v32, %v442_v13  ;;  %v499_v47 = vrot.slane %v498_v33, 2  ;;  %v410_v52 = vadd.f32 %v409_v35, %v408_v23  ;;  %v508_v57 = vrot.slane %v1195_v39, 7 }
  0xc4   : > { %v416_v58 = vadd.f32 %v415_v40, %v414_v27  ;;  %v439_v61 = vrot.slane %v438_v43, 1  ;;  %v494_v62 = vadd.f32 %v493_v44, %v492_v31  ;;  %v209_v6 = vadd.s32 128, %v208_v56 }
  0xc5   : > { %v445_v1 = vrot.slane %v444_v46, 1  ;;  %v500_v2 = vadd.f32 %v499_v47, %v498_v33  ;;  %v211_v8 = vadd.s32 384, %v208_v56  ;;  %v540_v30 = vsel %vm539_vm1, %v398_v34, %v507_v42 }
  0xc6   : > { %v440_v9 = vadd.f32 %v439_v61, %v438_v43  ;;  %v495_v10 = vrot.slane %v494_v62, 1  ;;  %vm213_vm2 = vcmp.lt.s32.totalorder %v209_v6, 196 }
  0xc7   : > { %v446_v14 = vadd.f32 %v445_v1, %v444_v46  ;;  %v501_v18 = vrot.slane %v500_v2, 1  ;;  %vm223_vm3 = vcmp.lt.s32.totalorder %v211_v8, 452 }
  0xc8   : > { %v509_v35 = vrot.slane %v440_v9, 7  ;;  %v496_v36 = vadd.f32 %v495_v10, %v494_v62 }
  0xc9   : > { %v320_v45 = vpop.f32.mrf.mxu0  ;;  %v510_v43 = vrot.slane %v446_v14, 7  ;;  %v502_v44 = vadd.f32 %v501_v18, %v500_v2 }
  0xca   : > { %v447_v48 = vmul.f32 %v1170_v15, %v320_v45  ;;  %v461_v49 = vmul.f32 %v332_v51, %v320_v45  ;;  %v373_v50 = vpop.f32.mrf.mxu1  ;;  %v411_v51 = vrot.slane %v410_v52, 1 }
  0xcb   : > { %v448_v53 = vmul.f32 %v1172_v16, %v373_v50  ;;  %v462_v54 = vmul.f32 %v385_v55, %v373_v50  ;;  %v417_v16 = vrot.slane %v416_v58, 1  ;;  %v533_v50 = vrot.slane %v496_v36, 5 }
  0xcc   : > { %v449_v59 = vrot.slane %v447_v48, 4  ;;  %v463_v60 = vrot.slane %v461_v49, 4  ;;  %v412_v26 = vadd.f32 %v411_v51, %v410_v52  ;;  %v534_v56 = vrot.slane %v502_v44, 5 }
  0xcd   : > { %v455_v63 = vrot.slane %v448_v53, 4  ;;  %v469_v0 = vrot.slane %v462_v54, 4  ;;  %v418_v31 = vadd.f32 %v417_v16, %v416_v58 }
  0xce   : > { %v450_v3 = vadd.f32 %v449_v59, %v447_v48  ;;  %v464_v15 = vadd.f32 %v463_v60, %v461_v49  ;;  %v541_v49 = vsel %vm539_vm1, %v1192_v37, %v508_v57 }
  0xcf   : > { %v456_v4 = vadd.f32 %v455_v63, %v448_v53  ;;  %v470_v5 = vadd.f32 %v469_v0, %v462_v54  ;;  %v542_v54 = vsel %vm539_vm1, %v412_v26, %v509_v35  ;;  %v543_v58 = vsel %vm539_vm1, %v418_v31, %v510_v43 }
  0xd0   : > { %v451_v55 = vrot.slane %v450_v3, 2  ;;  %v465_v7 = vrot.slane %v464_v15, 2 }
  0xd1   : > { %v457_v11 = vrot.slane %v456_v4, 2  ;;  %v471_v13 = vrot.slane %v470_v5, 2 }
  0xd2   : > { %v452_v23 = vadd.f32 %v451_v55, %v450_v3  ;;  %v466_v24 = vadd.f32 %v465_v7, %v464_v15  ;;  %v243_v7 = vld [vmem:[%s1294_s1 + $0x58] sm:$0xff] }
  0xd3   : > { %v458_v27 = vadd.f32 %v457_v11, %v456_v4  ;;  %v472_v29 = vadd.f32 %v471_v13, %v470_v5  ;;  %857 = vmatmul.msk.f32.gmra.mxu2 %vm248_vm0, %v243_v7  ;;  %869 = vmatmul.msk.f32.gmra.mxu3 %vm248_vm0, %v243_v7 }
  0xd4   : > { %v453_v32 = vrot.slane %v452_v23, 1  ;;  %v467_v33 = vrot.slane %v466_v24, 1 }
  0xd5   : > { %v459_v39 = vrot.slane %v458_v27, 1  ;;  %v473_v40 = vrot.slane %v472_v29, 1 }
  0xd6   : > { %v454_v45 = vadd.f32 %v453_v32, %v452_v23  ;;  %v468_v46 = vadd.f32 %v467_v33, %v466_v24 }
  0xd7   : > { %v460_v47 = vadd.f32 %v459_v39, %v458_v27  ;;  %v474_v48 = vadd.f32 %v473_v40, %v472_v29 }
  0xd8   : > { %v519_v34 = vrot.slane %v454_v45, 6  ;;  %v521_v42 = vrot.slane %v468_v46, 6 }
  0xd9   : > { %v520_v52 = vrot.slane %v460_v47, 6  ;;  %v522_v53 = vrot.slane %v474_v48, 6 }
  0xda   : > { %v545_v59 = vsel %vm544_vm4, %v540_v30, %v519_v34  ;;  %v547_v60 = vsel %vm544_vm4, %v542_v54, %v521_v42 }
  0xdb   : > { %v546_v61 = vsel %vm544_vm4, %v541_v49, %v520_v52  ;;  %v548_v62 = vsel %vm544_vm4, %v543_v58, %v522_v53  ;;  %v550_v37 = vsel %vm549_vm5, %v545_v59, %v531_v38  ;;  %v552_v57 = vsel %vm549_vm5, %v547_v60, %v533_v50 }
  0xdc   : > { %v551_v63 = vsel %vm549_vm5, %v546_v61, %v532_v41  ;;  %v553_v0 = vsel %vm549_vm5, %v548_v62, %v534_v56  ;;  %v554_v1 = vmul.f32 0.35355338, %v550_v37  ;;  %v556_v2 = vmul.f32 0.35355338, %v552_v57 }
  0xdd   : > { %v555_v3 = vmul.f32 0.35355338, %v551_v63  ;;  %v557_v15 = vmul.f32 0.35355338, %v553_v0 }
  0xde   : > { %v563_v51 = vsel %vm562_vm6, %v554_v1, -inf  ;;  %v565_v4 = vsel %vm562_vm6, %v556_v2, -inf }
  0xdf   : > { %v559_v5 = vsel %vm213_vm2, %v555_v3, -1e+30  ;;  %v561_v16 = vsel %vm223_vm3, %v557_v15, -1e+30 }
  0xe0   : > { %v564_v25 = vsel %vm562_vm6, %v559_v5, -inf  ;;  %v566_v38 = vsel %vm562_vm6, %v561_v16, -inf }
  0xe1   : > { %v567_v55 = vmax.f32 %v563_v51, %v564_v25  ;;  %v568_v28 = vmax.f32 %v565_v4, %v566_v38 }
  0xe3   : > { %v569_v41 = vmax.f32 %v567_v55, %v568_v28 }
  0xe5   : > { %570 = vmax.xlane.f32.xlu0 %v569_v41 }
 0x156   : > { %v335_v58 = vpop.f32.mrf.mxu2  ;;  %v388_v59 = vpop.f32.mrf.mxu3 }
 0x158   : > { %v571_v6 = vpop.xlane.xlu0 %570 }
 0x159   : > { %v572_v9 = vsub.f32 %v554_v1, %v571_v6  ;;  %v573_v8 = vsub.f32 %v559_v5, %v571_v6  ;;  %v574_v10 = vsub.f32 %v556_v2, %v571_v6  ;;  %v575_v11 = vsub.f32 %v561_v16, %v571_v6 }
 0x15b   : > { %v576_v13 = vmul.f32 1.442695, %v572_v9  ;;  %v578_v14 = vmul.f32 1.442695, %v573_v8  ;;  %v580_v18 = vmul.f32 1.442695, %v574_v10 }
 0x15c   : > { %v582_v23 = vmul.f32 1.442695, %v575_v11 }
 0x15d   : > { %931 = vpow2.f32 %v576_v13 }
 0x15e   : > { %933 = vpow2.f32 %v578_v14 }
 0x15f   : > { %935 = vpow2.f32 %v580_v18 }
 0x160   : > { %937 = vpow2.f32 %v582_v23 }
 0x163   : > { %v932_v24 = vpop.eup %931 }
 0x164   : > { %v934_v26 = vpop.eup %933  ;;  %v584_v27 = vsel %vm562_vm6, %v932_v24, 0.0 }
 0x165   : > { %v936_v29 = vpop.eup %935  ;;  %v585_v30 = vsel %vm562_vm6, %v934_v26, 0.0 }
 0x166   : > { %v938_v31 = vpop.eup %937  ;;  %v586_v32 = vadd.f32 %v585_v30, %v584_v27  ;;  %v587_v33 = vsel %vm562_vm6, %v936_v29, 0.0 }
 0x167   : > { %v589_v36 = vsel %vm562_vm6, %v938_v31, 0.0 }
 0x168   : > { %v588_v35 = vadd.f32 %v587_v33, %v586_v32 }
 0x16a   : > { %v590_v39 = vadd.f32 %v589_v36, %v588_v35 }
 0x16c   : > { %591 = vadd.xlane.f32.xlu0 %v590_v39 }
 0x1df   : > { %v592_v40 = vpop.xlane.xlu0 %591 }
 0x1e0   : > { %939 = vrcp.f32 %v592_v40  ;;  %v604_v46 = vand.u32 2147483648, %v592_v40  ;;  %v602_v48 = vand.u32 2147483647, %v592_v40  ;;  %vm598_vm8 = vweird.f32 %v592_v40 }
 0x1e2   : > { %v605_v34 = vor.u32 1.1754944e-38, %v604_v46  ;;  %vm603_vm10 = vcmp.eq.f32.partialorder %v602_v48, 8.507059e+37 }
 0x1e6   : > { %v940_v43 = vpop.eup %939 }
 0x1e7   : > { %v594_v44 = vmul.f32 %v940_v43, %v592_v40  ;;  %vm599_vm7 = vweird.f32 %v940_v43 }
 0x1e8   : > { %vm600_vm9 = vmor %vm598_vm8, %vm599_vm7 }
 0x1e9   : > { %v595_v45 = vsub.f32 1.0, %v594_v44 }
 0x1eb   : > { %v596_v47 = vmul.f32 %v940_v43, %v595_v45 }
 0x1ed   : > { %v597_v49 = vadd.f32 %v940_v43, %v596_v47 }
 0x1ef   : > { %v601_v42 = vsel %vm600_vm9, %v940_v43, %v597_v49 }
 0x1f0   : > { %v606_v50 = vsel %vm603_vm10, %v605_v34, %v601_v42 }
 0x1f1   : > { %v608_v52 = vmul.f32 %v932_v24, %v606_v50  ;;  %v609_v53 = vmul.f32 %v934_v26, %v606_v50  ;;  %v610_v54 = vmul.f32 %v936_v29, %v606_v50  ;;  %v611_v56 = vmul.f32 %v938_v31, %v606_v50 }
 0x1f3   : > { %v636_v60 = vperm.slane %v610_v54, 2  ;;  %v646_v61 = vperm.slane %v610_v54, 3  ;;  %v637_v62 = vperm.slane %v611_v56, 2  ;;  %v647_v37 = vperm.slane %v611_v56, 3 }
 0x1f4   : > { %v642_v57 = vperm.slane %v608_v52, 3  ;;  %v643_v63 = vperm.slane %v609_v53, 3  ;;  %v622_v0 = vperm.slane %v608_v52, 1  ;;  %v626_v1 = vperm.slane %v610_v54, 1 }
 0x1f5   : > { %v638_v2 = vmul.f32 %v636_v60, %v335_v58  ;;  %v648_v3 = vmul.f32 %v646_v61, %v335_v58  ;;  %v639_v15 = vmul.f32 %v637_v62, %v388_v59  ;;  %v649_v51 = vmul.f32 %v647_v37, %v388_v59 }
 0x1f6   : > { %v644_v4 = vmul.f32 %v642_v57, %v1174_v19  ;;  %v645_v5 = vmul.f32 %v643_v63, %v1176_v20  ;;  %v624_v16 = vmul.f32 %v622_v0, %v1178_v21  ;;  %v628_v25 = vmul.f32 %v626_v1, %v1184_v12 }
 0x1f7   : > { %v623_v38 = vperm.slane %v609_v53, 1  ;;  %v627_v55 = vperm.slane %v611_v56, 1  ;;  %v632_v28 = vperm.slane %v608_v52, 2  ;;  %v633_v41 = vperm.slane %v609_v53, 2 }
 0x1f8   : > { %v650_v7 = vadd.f32 %v648_v3, %v644_v4  ;;  %v651_v6 = vadd.f32 %v649_v51, %v645_v5  ;;  %v630_v9 = vadd.f32 %v628_v25, %v624_v16  ;;  %v612_v8 = vperm.slane %v608_v52, 0 }
 0x1f9   : > { %v625_v10 = vmul.f32 %v623_v38, %v1180_v22  ;;  %v629_v11 = vmul.f32 %v627_v55, %v1186_v17  ;;  %v634_v13 = vmul.f32 %v632_v28, %v1174_v19  ;;  %v635_v14 = vmul.f32 %v633_v41, %v1176_v20 }
 0x1fa   : > { %671 = vmatpush.msrb.mxu2 %v650_v7  ;;  %694 = vmatpush.msrb.mxu3 %v651_v6  ;;  %v614_v18 = vmul.f32 %v612_v8, %v1178_v21  ;;  %v616_v23 = vperm.slane %v610_v54, 0  ;;  %v613_v24 = vperm.slane %v609_v53, 0  ;;  %v617_v26 = vperm.slane %v611_v56, 0  ;;  %v244_v21 = vld [vmem:[%s1295_s2] sm:$0xff] }
 0x1fb   : > { %v631_v27 = vadd.f32 %v629_v11, %v625_v10  ;;  %v640_v29 = vadd.f32 %v638_v2, %v634_v13  ;;  %v641_v19 = vadd.f32 %v639_v15, %v635_v14 }
 0x1fc   : > { %672 = vmatpush.msrb.mxu2 %v630_v9  ;;  %v618_v30 = vmul.f32 %v616_v23, %v1184_v12  ;;  %v615_v31 = vmul.f32 %v613_v24, %v1180_v22  ;;  %v619_v32 = vmul.f32 %v617_v26, %v1186_v17  ;;  %v245_v22 = vld [vmem:[%s1295_s2 + $0x8] sm:$0xff] }
 0x1fd   : > { %695 = vmatpush.msrb.mxu3 %v631_v27 }
 0x1fe   : > { %673 = vmatpush.msrb.mxu2 %v640_v29  ;;  %v620_v20 = vadd.f32 %v618_v30, %v614_v18  ;;  %v621_v33 = vadd.f32 %v619_v32, %v615_v31 }
 0x1ff   : > { %696 = vmatpush.msrb.mxu3 %v641_v19 }
 0x200   : > { %674 = vmatpush.msrb.mxu2 %v620_v20 }
 0x201   : > { %697 = vmatpush.msrb.mxu3 %v621_v33  ;;  %870 = vmatmul.msk.f32.vlgmr.msrb.gmra.mxu2 %vm652_vm11, %v244_v21 }
 0x202   : > { %872 = vmatmul.msk.f32.vlgmr.msrb.gmra.mxu3 %vm652_vm11, %v244_v21 }
 0x209   : > { %871 = vmatmul.msk.f32.gmra.mxu2 %vm652_vm11, %v245_v22 }
 0x20a   : > { %873 = vmatmul.msk.f32.gmra.mxu3 %vm652_vm11, %v245_v22 }
 0x284   : > { %v676_v12 = vpop.f32.mrf.mxu2 }
 0x285   : > { %705 = vst [vmem:[%s194_s6] sm:$0xff] %v676_v12  ;;  %v699_v17 = vpop.f32.mrf.mxu3 }
 0x286   : > { %706 = vst [vmem:[%s194_s6 + $0x8] sm:$0xff] %v699_v17 }
 0x287   : > { %968 = shalt.err (!%p965_p3)
}
 0x288   : > { %887 = dma.vmem_to_hbm [thread:$0]  (%p1100_p5), %s729_s7, 256, %s731_s8, %s710_s19  }
 0x289   : > { %s201_s27 = scalar_lea.vmem [#allocation5], %s842_s28  ;;  %s745_s6 = sshll.u32 %s741_s11, 4  ;;  %s746_s6 = int_to_ptr.hbm [resolvable:$true] %s745_s6 }
 0x28a   : > { %s743_s5 = sshll.u32 %s201_s27, 4  ;;  %s715_s9 = scalar_lea.sflag [#allocation6], %s1244_s23  ;;  %s744_s5 = int_to_ptr.vmem [resolvable:$true] %s743_s5 }
 0x28b   : > { %s983_s10 = sshra.s32 %s746_s6, 4  ;;  %s989_s28 = scalar_lea.hbm %s1297_s4, 32  ;;  %s984_s10 = int_to_ptr.hbm [resolvable:$true] %s983_s10 }
 0x28c   : > { %v679_v35 = vpop.f32.mrf.mxu2  ;;  %s985_s12 = scalar_lea.hbm %s984_s10, 16  ;;  %p990_p9 = scmp.lt.s32.totalorder %s984_s10, %s1297_s4 }
 0x28d   : > { %707 = vst [vmem:[%s201_s27] sm:$0xff] %v679_v35  ;;  %v702_v36 = vpop.f32.mrf.mxu3  ;;  %p986_p4 = scmp.ne.s32.totalorder %s984_s10, %s985_s12  ;;  %p991_p10 = scmp.lt.s32.totalorder %s989_s28, %s985_s12 }
 0x28e   : > { %708 = vst [vmem:[%s201_s27 + $0x8] sm:$0xff] %v702_v36 }
 0x28f   : > { %p987_p7 = pnand %p986_p4, %p1100_p5  ;;  %p992_p11 = por %p991_p10, %p990_p9 }
 0x291   : > { %p988_p8 = pneg %p987_p7 }
 0x293   : > { %p993_p12 = pnand %p992_p11, %p988_p8 }
 0x295   : > { %996 = shalt.err (!%p993_p12)
}
 0x296   : > { %888 = dma.vmem_to_hbm [thread:$0]  (%p1100_p5), %s744_s5, 256, %s746_s6, %s715_s9  }
 0x297 PF: > { %p898_p13 = scmp.ge.s32.totalorder %s1035_s18, 2  ;;  %s757_s23 = sand.u32 1, %s1023_s15  }
 0x298   : > { %s758_s11 = scalar_lea.sflag [#allocation4], %s757_s23 }
 0x299   : > { %p892_p0 = pnand %p898_p13, %p1104_p6 }
 0x29b   : > { %p893_p1 = pneg %p892_p0 }
 0x29d   : > { %1014 = dma.done.wait (%p893_p1), %s758_s11, 256  }
 0x29e   : > { %1016 = vsyncadd (%p893_p1), %s758_s11, 4294967040  ;;  %s768_s19 = scalar_lea.sflag [#allocation6], %s757_s23 }
 0x29f   : > { %1018 = dma.done.wait (%p893_p1), %s768_s19, 256  }
 0x2a0   : > { %1020 = vsyncadd (%p893_p1), %s768_s19, 4294967040  ;;  %p18_p5 = scmp.ge.s32.totalorder %s1087_s21, 4   ;;  %s1300_s15 = smov %s1027_s16 }
 0x2a1   : > { %s1301_s16 = smov %s1031_s17  ;;  %s1302_s17 = smov %s1098_s24 }
 0x2a2   : > { %s1303_s18 = smov %s1087_s21  ;;  %20 = sbr.rel (!%p18_p5) target bundleno = 5 (0x5), region = 84 }
 0x2a7   :  { %774 = vsyncpa [#allocation4], 1 }
 0x2a8   :  { %776 = vsyncpa [#allocation4 + $0x1], 1 }
 0x2a9   :  { %777 = vsyncpa [#allocation6], 1 }
 0x2aa   :  { %779 = vsyncpa [#allocation6 + $0x1], 1 }

</bundles_post_ra>
